<compile_context>
chip_gen: v7x
topology: tpu7x:2x2x1
jax: 0.10.0
libtpu: 0.0.40
codegen_flags: <defaults>
</compile_context>

<pallas_src>
import math
from functools import partial

import jax
import jax.numpy as jnp
from jax import lax
from jax.experimental import pallas as pl
from jax.experimental.pallas import tpu as pltpu


def _round_up(x, m):
    return ((x + m - 1) // m) * m


def _pick_v_tile(vp, max_tile=1024):
    """Largest multiple of 128 that divides vp and is <= max_tile."""
    best = 128
    t = 128
    while t <= min(vp, max_tile):
        if vp % t == 0:
            best = t
        t += 128
    return best


# ------------------------------------------------------------------ kernels --

def _attend_and_feature(batch, scale, q, enc_bf, wd, bd):
    """Cross-attention + decoder feature for all batches.

    q: (B*T, Dp) bf16, enc_bf: (B*S, Dp) bf16, wd: (Dp, Dp) bf16, bd: (1, Dp) f32.
    Returns feat (B*T, Dp) f32.
    """
    BT, Dp = q.shape
    T = BT // batch
    S = enc_bf.shape[0] // batch
    q3 = q.reshape(batch, T, Dp)
    e3 = enc_bf.reshape(batch, S, Dp)
    # NT batched dot: contract Dp, batch over B (no transpose materialized).
    scores = lax.dot_general(
        q3, e3, dimension_numbers=(((2,), (2,)), ((0,), (0,))),
        preferred_element_type=jnp.float32) * scale                      # (B, T, S) f32
    m = jnp.max(scores, axis=-1, keepdims=True)
    p = jnp.exp(scores - m)
    attn = p / jnp.sum(p, axis=-1, keepdims=True)                        # exact softmax, f32
    ctx = lax.dot_general(
        attn.astype(jnp.bfloat16), e3,
        dimension_numbers=(((2,), (1,)), ((0,), (0,))),
        preferred_element_type=jnp.float32)                              # (B, T, Dp) f32
    h = (q3.astype(jnp.float32) + ctx).reshape(BT, Dp).astype(jnp.bfloat16)
    return jnp.tanh(jnp.dot(h, wd, preferred_element_type=jnp.float32) + bd)


def _fused_enc_dec_kernel(batch, scale, src_ref, dec_ref,
                          we_ref, be_ref, wd_ref, bd_ref, wo_ref, bo_ref,
                          logits_ref, enc_ref, feat_ref):
    # Grid = (K, NV). Key dim squeezed by BlockSpecs:
    #   src_ref: (B*S, Dp) bf16   dec_ref: (B*T, Dp) bf16
    #   we/wd: (Dp, Dp) bf16      be/bd: (1, Dp) f32
    #   wo_ref: (Dp, VT) bf16     bo_ref: (1, VT) f32
    #   logits_ref: (B*T, VT) f32 enc_ref: (B*S, Dp) f32
    #   feat_ref: VMEM scratch (B*T, Dp) bf16, persists across the V axis.
    @pl.when(pl.program_id(1) == 0)
    def _():
        # ---- encoder: one (B*S,Dp)@(Dp,Dp) MXU matmul per key ----
        x = src_ref[...]
        enc = jnp.tanh(jnp.dot(x, we_ref[...],
                               preferred_element_type=jnp.float32) + be_ref[...])
        enc_ref[...] = enc.astype(enc_ref.dtype)   # stays resident across the V axis
        # ---- decoder cross-attention + feature (f32 softmax/tanh, bf16 MXU) ----
        feat = _attend_and_feature(batch, scale, dec_ref[...],
                                   enc.astype(jnp.bfloat16), wd_ref[...], bd_ref[...])
        feat_ref[...] = feat.astype(jnp.bfloat16)

    # ---- output projection for the current vocab tile (every V step) ----
    logits_ref[...] = (jnp.dot(feat_ref[...], wo_ref[...],
                               preferred_element_type=jnp.float32)
                       + bo_ref[...]).astype(logits_ref.dtype)


def _decoder_only_kernel(batch, scale, dec_ref, enc_ref,
                         wd_ref, bd_ref, wo_ref, bo_ref, logits_ref, feat_ref):
    @pl.when(pl.program_id(0) == 0)
    def _():
        feat = _attend_and_feature(batch, scale, dec_ref[...], enc_ref[...],
                                   wd_ref[...], bd_ref[...])
        feat_ref[...] = feat.astype(jnp.bfloat16)
    logits_ref[...] = (jnp.dot(feat_ref[...], wo_ref[...],
                               preferred_element_type=jnp.float32)
                       + bo_ref[...]).astype(logits_ref.dtype)


# ------------------------------------------------------------ pallas wrappers --

def multi_encdec_forward(src_emb, dec_emb, w_enc, b_enc, w_dec, b_dec,
                         w_out, b_out, *, batch, scale):
    """All-keys fused encoder->decoder forward.

    src_emb: (K, B*S, Dp) bf16   dec_emb: (K, B*T, Dp) bf16
    w_enc/w_dec: (K, Dp, Dp) bf16   b_enc/b_dec: (K, 1, Dp) f32
    w_out: (K, Dp, Vp) bf16         b_out: (K, 1, Vp) f32
    Returns logits (K, B*T, Vp) f32 and enc_out (K, B*S, Dp) f32.
    """
    K, BS, Dp = src_emb.shape
    BT = dec_emb.shape[1]
    Vp = w_out.shape[-1]
    VT = _pick_v_tile(Vp)
    NV = Vp // VT

    grid_spec = pltpu.PrefetchScalarGridSpec(
        num_scalar_prefetch=0,
        grid=(K, NV),
        in_specs=[
            pl.BlockSpec((None, BS, Dp), lambda k, v: (k, 0, 0)),   # src_emb (key squeezed)
            pl.BlockSpec((None, BT, Dp), lambda k, v: (k, 0, 0)),   # dec_emb
            pl.BlockSpec((None, Dp, Dp), lambda k, v: (k, 0, 0)),   # w_enc
            pl.BlockSpec((None, 1, Dp), lambda k, v: (k, 0, 0)),    # b_enc
            pl.BlockSpec((None, Dp, Dp), lambda k, v: (k, 0, 0)),   # w_dec
            pl.BlockSpec((None, 1, Dp), lambda k, v: (k, 0, 0)),    # b_dec
            pl.BlockSpec((None, Dp, VT), lambda k, v: (k, 0, v)),   # w_out tile over V
            pl.BlockSpec((None, 1, VT), lambda k, v: (k, 0, v)),    # b_out tile over V
        ],
        out_specs=[
            pl.BlockSpec((None, BT, VT), lambda k, v: (k, 0, v)),   # logits tile over V
            pl.BlockSpec((None, BS, Dp), lambda k, v: (k, 0, 0)),   # enc_out (written at v==0)
        ],
        scratch_shapes=[pltpu.VMEM((BT, Dp), jnp.bfloat16)],        # feat, persists over V
    )
    return pl.pallas_call(
        partial(_fused_enc_dec_kernel, batch, scale),
        out_shape=(jax.ShapeDtypeStruct((K, BT, Vp), jnp.float32),
                   jax.ShapeDtypeStruct((K, BS, Dp), jnp.float32)),
        grid_spec=grid_spec,
        compiler_params=pltpu.CompilerParams(
            dimension_semantics=("parallel", "arbitrary"),
            vmem_limit_bytes=32 * 1024 * 1024),
    )(src_emb, dec_emb, w_enc, b_enc, w_dec, b_dec, w_out, b_out)


def decoder_forward(dec_emb, enc_out, w_dec, b_dec, w_out, b_out, *, batch, scale):
    """Decoder applied with a given encoder_out (FairseqMultiModel.forward_decoder).

    dec_emb: (B*T, Dp) bf16, enc_out: (B*S, Dp) bf16. Returns (B*T, Vp) f32.
    """
    BT, Dp = dec_emb.shape
    BS = enc_out.shape[0]
    Vp = w_out.shape[-1]
    VT = _pick_v_tile(Vp)
    NV = Vp // VT
    grid_spec = pltpu.PrefetchScalarGridSpec(
        num_scalar_prefetch=0,
        grid=(NV,),
        in_specs=[
            pl.BlockSpec((BT, Dp), lambda v: (0, 0)),
            pl.BlockSpec((BS, Dp), lambda v: (0, 0)),
            pl.BlockSpec((Dp, Dp), lambda v: (0, 0)),
            pl.BlockSpec((1, Dp), lambda v: (0, 0)),
            pl.BlockSpec((Dp, VT), lambda v: (0, v)),
            pl.BlockSpec((1, VT), lambda v: (0, v)),
        ],
        out_specs=pl.BlockSpec((BT, VT), lambda v: (0, v)),
        scratch_shapes=[pltpu.VMEM((BT, Dp), jnp.bfloat16)],
    )
    return pl.pallas_call(
        partial(_decoder_only_kernel, batch, scale),
        out_shape=jax.ShapeDtypeStruct((BT, Vp), jnp.float32),
        grid_spec=grid_spec,
        compiler_params=pltpu.CompilerParams(
            dimension_semantics=("arbitrary",),
            vmem_limit_bytes=32 * 1024 * 1024),
    )(dec_emb, enc_out, w_dec, b_dec, w_out, b_out)


# --------------------------------------------------------------- model glue --

class FairseqMultiModelPallas:
    """Dict of encoder-decoder models mirroring FairseqMultiModel structure.

    Per-key weights are stacked along a leading 'key' axis; one fused pallas_call
    (grid over keys x vocab tiles) runs every key's encoder->decoder forward.
    Weights are stored bf16, zero-padded lane-dense (embed dim -> Dp=128-multiple,
    vocab -> Vp=128-multiple); biases stay f32.
    """

    def __init__(self, keys, vocab, embed_dim, rng):
        self.keys = list(keys)
        self.vocab = vocab
        self.embed_dim = embed_dim
        self.dim_padded = _round_up(embed_dim, 128)
        self.vocab_padded = _round_up(vocab, 128)
        K, D, Dp, V, Vp = (len(self.keys), embed_dim, self.dim_padded,
                           vocab, self.vocab_padded)
        ks = jax.random.split(rng, 5)
        s = 0.02
        enc_embed = s * jax.random.normal(ks[0], (K, V, D), jnp.float32)
        dec_embed = s * jax.random.normal(ks[1], (K, V, D), jnp.float32)
        w_enc = s * jax.random.normal(ks[2], (K, D, D), jnp.float32)
        w_dec = s * jax.random.normal(ks[3], (K, D, D), jnp.float32)
        w_out = s * jax.random.normal(ks[4], (K, D, V), jnp.float32)

        def pad_last(a, to):
            return jnp.pad(a, [(0, 0)] * (a.ndim - 1) + [(0, to - a.shape[-1])])

        self.params = {
            "enc_embed": pad_last(enc_embed, Dp).astype(jnp.bfloat16),   # (K,V,Dp)
            "dec_embed": pad_last(dec_embed, Dp).astype(jnp.bfloat16),
            "w_enc": jnp.pad(w_enc, ((0, 0), (0, Dp - D), (0, Dp - D))).astype(jnp.bfloat16),
            "b_enc": jnp.zeros((K, 1, Dp), jnp.float32),
            "w_dec": jnp.pad(w_dec, ((0, 0), (0, Dp - D), (0, Dp - D))).astype(jnp.bfloat16),
            "b_dec": jnp.zeros((K, 1, Dp), jnp.float32),
            "w_out": jnp.pad(w_out, ((0, 0), (0, Dp - D), (0, Vp - V))).astype(jnp.bfloat16),
            "b_out": jnp.zeros((K, 1, Vp), jnp.float32),
        }

    # FairseqMultiModel.forward raises NotImplementedError upstream; the real compute
    # path is the per-key FairseqEncoderDecoderModel.forward, run for ALL keys fused.
    def forward_all(self, src_tokens, src_lengths, prev_output_tokens):
        del src_lengths  # all sequences are full length in this synthetic setup
        p = self.params
        K = len(self.keys)
        B, S = src_tokens.shape
        T = prev_output_tokens.shape[1]
        Dp, Vp = self.dim_padded, self.vocab_padded
        # embedding lookups are glue (plain-JAX gather), per key; B folded into M dim
        src_emb = jnp.take(p["enc_embed"], src_tokens, axis=1).reshape(K, B * S, Dp)
        dec_emb = jnp.take(p["dec_embed"], prev_output_tokens, axis=1).reshape(K, B * T, Dp)
        logits_p, enc_p = multi_encdec_forward(
            src_emb, dec_emb, p["w_enc"], p["b_enc"], p["w_dec"], p["b_dec"],
            p["w_out"], p["b_out"],
            batch=B, scale=1.0 / math.sqrt(self.embed_dim))
        logits = logits_p.reshape(K, B, T, Vp)[..., :self.vocab]       # drop lane padding
        enc_out = enc_p.reshape(K, B, S, Dp)[..., :self.embed_dim]
        return {key: (logits[i], {"encoder_out": enc_out[i]})
                for i, key in enumerate(self.keys)}

    # mirrors FairseqMultiModel.decoder property (first key's decoder) +
    # forward_decoder: that decoder applied with a given encoder_out.
    def forward_decoder(self, prev_output_tokens, encoder_out):
        p = self.params
        B, T = prev_output_tokens.shape
        S = encoder_out.shape[1]
        D, Dp, Vp = self.embed_dim, self.dim_padded, self.vocab_padded
        dec_emb = jnp.take(p["dec_embed"][0], prev_output_tokens, axis=0).reshape(B * T, Dp)
        enc = jnp.pad(encoder_out, ((0, 0), (0, 0), (0, Dp - D)))
        enc = enc.astype(jnp.bfloat16).reshape(B * S, Dp)
        logits_p = decoder_forward(dec_emb, enc,
                                   p["w_dec"][0], p["b_dec"][0],
                                   p["w_out"][0], p["b_out"][0],
                                   batch=B, scale=1.0 / math.sqrt(D))
        return logits_p.reshape(B, T, Vp)[..., :self.vocab]


# ------------------------------------------------------------ pure-JAX ref --

def _reference_forward(params, key_idx, src_tokens, prev_output_tokens, vocab, dim):
    f32 = lambda a: a[key_idx].astype(jnp.float32)
    src_emb = jnp.take(f32(params["enc_embed"]), src_tokens, axis=0)    # (B,S,Dp)
    dec_emb = jnp.take(f32(params["dec_embed"]), prev_output_tokens, axis=0)
    enc = jnp.tanh(src_emb @ f32(params["w_enc"]) + f32(params["b_enc"]))
    scores = jnp.einsum("btd,bsd->bts", dec_emb, enc) / math.sqrt(dim)
    attn = jax.nn.softmax(scores, axis=-1)
    ctx = jnp.einsum("bts,bsd->btd", attn, enc)
    feat = jnp.tanh((dec_emb + ctx) @ f32(params["w_dec"]) + f32(params["b_dec"]))
    logits = feat @ f32(params["w_out"]) + f32(params["b_out"])
    return logits[..., :vocab], enc[..., :dim]


# ---------------------------------------------------------------------- main --

if __name__ == "__main__":
    B, S, T, D, V = 2, 8, 8, 32, 64     # batch, src_len, tgt_len, embed_dim, vocab
    rng = jax.random.PRNGKey(0)
    r_model, r_src, r_prev = jax.random.split(rng, 3)

    model = FairseqMultiModelPallas(keys=["en-de", "en-fr"],
                                    vocab=V, embed_dim=D, rng=r_model)

    src_tokens = jax.random.randint(r_src, (B, S), 0, V, dtype=jnp.int32)
    src_lengths = jnp.full((B,), S, dtype=jnp.int32)
    prev_output_tokens = jax.random.randint(r_prev, (B, T), 0, V, dtype=jnp.int32)

    # one fused kernel call covers every key's encoder->decoder forward
    outs = model.forward_all(src_tokens, src_lengths, prev_output_tokens)
    jax.block_until_ready(outs)

    # also exercise forward_decoder (first key's decoder, given encoder_out)
    enc_out_first = outs[model.keys[0]][1]["encoder_out"]
    fd = model.forward_decoder(prev_output_tokens, enc_out_first)
    jax.block_until_ready(fd)

    # shape / numerics checks against a pure-JAX reference (bf16-weight tolerance)
    for i, key in enumerate(model.keys):
        lg, extra = outs[key]
        eo = extra["encoder_out"]
        assert lg.shape == (B, T, V) and lg.dtype == jnp.float32
        assert eo.shape == (B, S, D)
        ref_lg, ref_eo = _reference_forward(model.params, i, src_tokens,
                                            prev_output_tokens, V, D)
        assert jnp.allclose(eo, ref_eo, atol=1e-2, rtol=1e-2)
        assert jnp.allclose(lg, ref_lg, atol=1e-2, rtol=1e-2)

    assert fd.shape == (B, T, V)
    ref_fd, _ = _reference_forward(model.params, 0, src_tokens,
                                   prev_output_tokens, V, D)
    assert jnp.allclose(fd, ref_fd, atol=1e-2, rtol=1e-2)

    print("KERNEL_OK")
</pallas_src>

<mosaic_0001>
module attributes {stable_mosaic.version = 11 : i64} {
  func.func @_fused_enc_dec_kernel(%arg0: i32, %arg1: i32, %arg2: memref<1x16x128xbf16, #tpu.memory_space<vmem>>, %arg3: memref<1x16x128xbf16, #tpu.memory_space<vmem>>, %arg4: memref<1x128x128xbf16, #tpu.memory_space<vmem>>, %arg5: memref<1x1x128xf32, #tpu.memory_space<vmem>>, %arg6: memref<1x128x128xbf16, #tpu.memory_space<vmem>>, %arg7: memref<1x1x128xf32, #tpu.memory_space<vmem>>, %arg8: memref<1x128x128xbf16, #tpu.memory_space<vmem>>, %arg9: memref<1x1x128xf32, #tpu.memory_space<vmem>>, %arg10: memref<1x16x128xf32, #tpu.memory_space<vmem>>, %arg11: memref<1x16x128xf32, #tpu.memory_space<vmem>>, %arg12: memref<16x128xbf16, #tpu.memory_space<vmem>>) attributes {dimension_semantics = [#tpu.dimension_semantics<parallel>, #tpu.dimension_semantics<arbitrary>], iteration_bounds = array<i64: 2, 1>, scalar_prefetch = 0 : i64, scratch_operands = 1 : i64, tpu.core_type = #tpu.core_type<tc>, window_params = [{transform_indices = @transform_0, window_bounds = array<i64: 1, 16, 128>}, {transform_indices = @transform_1, window_bounds = array<i64: 1, 16, 128>}, {transform_indices = @transform_2, window_bounds = array<i64: 1, 128, 128>}, {transform_indices = @transform_3, window_bounds = array<i64: 1, 1, 128>}, {transform_indices = @transform_4, window_bounds = array<i64: 1, 128, 128>}, {transform_indices = @transform_5, window_bounds = array<i64: 1, 1, 128>}, {transform_indices = @transform_6, window_bounds = array<i64: 1, 128, 128>}, {transform_indices = @transform_7, window_bounds = array<i64: 1, 1, 128>}, {transform_indices = @transform_8, window_bounds = array<i64: 1, 16, 128>}, {transform_indices = @transform_9, window_bounds = array<i64: 1, 16, 128>}]} {
    %c0_i32 = arith.constant 0 : i32
    %0 = arith.cmpi eq, %arg1, %c0_i32 : i32
    %1 = arith.extui %0 : i1 to i32
    %c0_i32_0 = arith.constant 0 : i32
    %2 = arith.cmpi ne, %1, %c0_i32_0 : i32
    scf.if %2 {
      %c0_11 = arith.constant 0 : index
      %c0_12 = arith.constant 0 : index
      %c0_13 = arith.constant 0 : index
      %14 = vector.load %arg2[%c0_11, %c0_12, %c0_13] : memref<1x16x128xbf16, #tpu.memory_space<vmem>>, vector<1x16x128xbf16>
      %15 = vector.shape_cast %14 : vector<1x16x128xbf16> to vector<16x128xbf16>
      %c0_14 = arith.constant 0 : index
      %c0_15 = arith.constant 0 : index
      %c0_16 = arith.constant 0 : index
      %16 = vector.load %arg4[%c0_14, %c0_15, %c0_16] : memref<1x128x128xbf16, #tpu.memory_space<vmem>>, vector<1x128x128xbf16>
      %17 = vector.shape_cast %16 : vector<1x128x128xbf16> to vector<128x128xbf16>
      %cst_17 = arith.constant dense<0.000000e+00> : vector<16x128xf32>
      %18 = tpu.matmul %15, %17, %cst_17 {dimension_numbers = #tpu.dot_dimension_numbers<[1], [0], [0], [1], [0, 0, 1, 1], [], []>} : vector<16x128xbf16>, vector<128x128xbf16>, vector<16x128xf32> -> vector<16x128xf32>
      %c0_18 = arith.constant 0 : index
      %c0_19 = arith.constant 0 : index
      %c0_20 = arith.constant 0 : index
      %19 = vector.load %arg5[%c0_18, %c0_19, %c0_20] : memref<1x1x128xf32, #tpu.memory_space<vmem>>, vector<1x1x128xf32>
      %20 = vector.shape_cast %19 : vector<1x1x128xf32> to vector<1x128xf32>
      %21 = vector.broadcast %20 : vector<1x128xf32> to vector<16x128xf32>
      %22 = arith.addf %18, %21 : vector<16x128xf32>
      %23 = math.tanh %22 : vector<16x128xf32>
      %c0_21 = arith.constant 0 : index
      %c0_22 = arith.constant 0 : index
      %c0_23 = arith.constant 0 : index
      %24 = vector.load %arg11[%c0_21, %c0_22, %c0_23] : memref<1x16x128xf32, #tpu.memory_space<vmem>>, vector<1x16x128xf32>
      %25 = vector.shape_cast %24 : vector<1x16x128xf32> to vector<16x128xf32>
      %26 = vector.shape_cast %23 : vector<16x128xf32> to vector<1x16x128xf32>
      tpu.vector_store %arg11[%c0_21, %c0_22, %c0_23], %26 {strides = array<i32>} : memref<1x16x128xf32, #tpu.memory_space<vmem>>, vector<1x16x128xf32>,
      %c0_24 = arith.constant 0 : index
      %c0_25 = arith.constant 0 : index
      %c0_26 = arith.constant 0 : index
      %27 = vector.load %arg3[%c0_24, %c0_25, %c0_26] : memref<1x16x128xbf16, #tpu.memory_space<vmem>>, vector<1x16x128xbf16>
      %28 = vector.shape_cast %27 : vector<1x16x128xbf16> to vector<16x128xbf16>
      %29 = arith.truncf %23 : vector<16x128xf32> to vector<16x128xbf16>
      %c0_27 = arith.constant 0 : index
      %c0_28 = arith.constant 0 : index
      %c0_29 = arith.constant 0 : index
      %30 = vector.load %arg6[%c0_27, %c0_28, %c0_29] : memref<1x128x128xbf16, #tpu.memory_space<vmem>>, vector<1x128x128xbf16>
      %31 = vector.shape_cast %30 : vector<1x128x128xbf16> to vector<128x128xbf16>
      %c0_30 = arith.constant 0 : index
      %c0_31 = arith.constant 0 : index
      %c0_32 = arith.constant 0 : index
      %32 = vector.load %arg7[%c0_30, %c0_31, %c0_32] : memref<1x1x128xf32, #tpu.memory_space<vmem>>, vector<1x1x128xf32>
      %33 = vector.shape_cast %32 : vector<1x1x128xf32> to vector<1x128xf32>
      %34 = vector.shape_cast %28 : vector<16x128xbf16> to vector<2x8x128xbf16>
      %35 = vector.shape_cast %29 : vector<16x128xbf16> to vector<2x8x128xbf16>
      %cst_33 = arith.constant dense<0.000000e+00> : vector<2x8x8xf32>
      %36 = tpu.matmul %34, %35, %cst_33 {dimension_numbers = #tpu.dot_dimension_numbers<[2], [2], [1], [1], [0, 0, 0, 1, 1, 1], [0], [0]>} : vector<2x8x128xbf16>, vector<2x8x128xbf16>, vector<2x8x8xf32> -> vector<2x8x8xf32>
      %cst_34 = arith.constant 0.176776692 : f32
      %37 = vector.broadcast %cst_34 : f32 to vector<2x8x8xf32>
      %38 = arith.mulf %36, %37 : vector<2x8x8xf32>
      %cst_35 = arith.constant dense<0xFF800000> : vector<2x8xf32>
      %39 = vector.multi_reduction <maximumf>, %38, %cst_35 [2] : vector<2x8x8xf32> to vector<2x8xf32>
      %40 = vector.shape_cast %39 : vector<2x8xf32> to vector<2x8x1xf32>
      %41 = vector.broadcast %40 : vector<2x8x1xf32> to vector<2x8x8xf32>
      %42 = arith.subf %38, %41 : vector<2x8x8xf32>
      %43 = math.exp %42 : vector<2x8x8xf32>
      %cst_36 = arith.constant dense<0.000000e+00> : vector<2x8xf32>
      %44 = vector.multi_reduction <add>, %43, %cst_36 [2] : vector<2x8x8xf32> to vector<2x8xf32>
      %45 = vector.shape_cast %44 : vector<2x8xf32> to vector<2x8x1xf32>
      %46 = vector.broadcast %45 : vector<2x8x1xf32> to vector<2x8x8xf32>
      %47 = arith.divf %43, %46 : vector<2x8x8xf32>
      %48 = arith.truncf %47 : vector<2x8x8xf32> to vector<2x8x8xbf16>
      %cst_37 = arith.constant dense<0.000000e+00> : vector<2x8x128xf32>
      %49 = tpu.matmul %48, %35, %cst_37 {dimension_numbers = #tpu.dot_dimension_numbers<[2], [1], [1], [2], [0, 0, 0, 1, 1, 2], [0], [0]>} : vector<2x8x8xbf16>, vector<2x8x128xbf16>, vector<2x8x128xf32> -> vector<2x8x128xf32>
      %50 = arith.extf %34 : vector<2x8x128xbf16> to vector<2x8x128xf32>
      %51 = arith.addf %50, %49 : vector<2x8x128xf32>
      %52 = vector.shape_cast %51 : vector<2x8x128xf32> to vector<16x128xf32>
      %53 = arith.truncf %52 : vector<16x128xf32> to vector<16x128xbf16>
      %cst_38 = arith.constant dense<0.000000e+00> : vector<16x128xf32>
      %54 = tpu.matmul %53, %31, %cst_38 {dimension_numbers = #tpu.dot_dimension_numbers<[1], [0], [0], [1], [0, 0, 1, 1], [], []>} : vector<16x128xbf16>, vector<128x128xbf16>, vector<16x128xf32> -> vector<16x128xf32>
      %55 = vector.broadcast %33 : vector<1x128xf32> to vector<16x128xf32>
      %56 = arith.addf %54, %55 : vector<16x128xf32>
      %57 = math.tanh %56 : vector<16x128xf32>
      %58 = arith.truncf %57 : vector<16x128xf32> to vector<16x128xbf16>
      %c0_39 = arith.constant 0 : index
      %c0_40 = arith.constant 0 : index
      %59 = vector.load %arg12[%c0_39, %c0_40] : memref<16x128xbf16, #tpu.memory_space<vmem>>, vector<16x128xbf16>
      tpu.vector_store %arg12[%c0_39, %c0_40], %58 {strides = array<i32>} : memref<16x128xbf16, #tpu.memory_space<vmem>>, vector<16x128xbf16>,
    } else {
    }
    %c0 = arith.constant 0 : index
    %c0_1 = arith.constant 0 : index
    %3 = vector.load %arg12[%c0, %c0_1] : memref<16x128xbf16, #tpu.memory_space<vmem>>, vector<16x128xbf16>
    %c0_2 = arith.constant 0 : index
    %c0_3 = arith.constant 0 : index
    %c0_4 = arith.constant 0 : index
    %4 = vector.load %arg8[%c0_2, %c0_3, %c0_4] : memref<1x128x128xbf16, #tpu.memory_space<vmem>>, vector<1x128x128xbf16>
    %5 = vector.shape_cast %4 : vector<1x128x128xbf16> to vector<128x128xbf16>
    %cst = arith.constant dense<0.000000e+00> : vector<16x128xf32>
    %6 = tpu.matmul %3, %5, %cst {dimension_numbers = #tpu.dot_dimension_numbers<[1], [0], [0], [1], [0, 0, 1, 1], [], []>} : vector<16x128xbf16>, vector<128x128xbf16>, vector<16x128xf32> -> vector<16x128xf32>
    %c0_5 = arith.constant 0 : index
    %c0_6 = arith.constant 0 : index
    %c0_7 = arith.constant 0 : index
    %7 = vector.load %arg9[%c0_5, %c0_6, %c0_7] : memref<1x1x128xf32, #tpu.memory_space<vmem>>, vector<1x1x128xf32>
    %8 = vector.shape_cast %7 : vector<1x1x128xf32> to vector<1x128xf32>
    %9 = vector.broadcast %8 : vector<1x128xf32> to vector<16x128xf32>
    %10 = arith.addf %6, %9 : vector<16x128xf32>
    %c0_8 = arith.constant 0 : index
    %c0_9 = arith.constant 0 : index
    %c0_10 = arith.constant 0 : index
    %11 = vector.load %arg10[%c0_8, %c0_9, %c0_10] : memref<1x16x128xf32, #tpu.memory_space<vmem>>, vector<1x16x128xf32>
    %12 = vector.shape_cast %11 : vector<1x16x128xf32> to vector<16x128xf32>
    %13 = vector.shape_cast %10 : vector<16x128xf32> to vector<1x16x128xf32>
    tpu.vector_store %arg10[%c0_8, %c0_9, %c0_10], %13 {strides = array<i32>} : memref<1x16x128xf32, #tpu.memory_space<vmem>>, vector<1x16x128xf32>,
    return
  }
  func.func @transform_0(%arg0: i32, %arg1: i32) -> (i32, i32, i32) {
    %c0_i32 = arith.constant 0 : i32
    %c0_i32_0 = arith.constant 0 : i32
    %c0_i32_1 = arith.constant 0 : i32
    return %arg0, %c0_i32, %c0_i32_0 : i32, i32, i32
  }
  func.func @transform_1(%arg0: i32, %arg1: i32) -> (i32, i32, i32) {
    %c0_i32 = arith.constant 0 : i32
    %c0_i32_0 = arith.constant 0 : i32
    %c0_i32_1 = arith.constant 0 : i32
    return %arg0, %c0_i32, %c0_i32_0 : i32, i32, i32
  }
  func.func @transform_2(%arg0: i32, %arg1: i32) -> (i32, i32, i32) {
    %c0_i32 = arith.constant 0 : i32
    %c0_i32_0 = arith.constant 0 : i32
    %c0_i32_1 = arith.constant 0 : i32
    return %arg0, %c0_i32, %c0_i32_0 : i32, i32, i32
  }
  func.func @transform_3(%arg0: i32, %arg1: i32) -> (i32, i32, i32) {
    %c0_i32 = arith.constant 0 : i32
    %c0_i32_0 = arith.constant 0 : i32
    %c0_i32_1 = arith.constant 0 : i32
    return %arg0, %c0_i32, %c0_i32_0 : i32, i32, i32
  }
  func.func @transform_4(%arg0: i32, %arg1: i32) -> (i32, i32, i32) {
    %c0_i32 = arith.constant 0 : i32
    %c0_i32_0 = arith.constant 0 : i32
    %c0_i32_1 = arith.constant 0 : i32
    return %arg0, %c0_i32, %c0_i32_0 : i32, i32, i32
  }
  func.func @transform_5(%arg0: i32, %arg1: i32) -> (i32, i32, i32) {
    %c0_i32 = arith.constant 0 : i32
    %c0_i32_0 = arith.constant 0 : i32
    %c0_i32_1 = arith.constant 0 : i32
    return %arg0, %c0_i32, %c0_i32_0 : i32, i32, i32
  }
  func.func @transform_6(%arg0: i32, %arg1: i32) -> (i32, i32, i32) {
    %c0_i32 = arith.constant 0 : i32
    %c0_i32_0 = arith.constant 0 : i32
    return %arg0, %c0_i32, %arg1 : i32, i32, i32
  }
  func.func @transform_7(%arg0: i32, %arg1: i32) -> (i32, i32, i32) {
    %c0_i32 = arith.constant 0 : i32
    %c0_i32_0 = arith.constant 0 : i32
    return %arg0, %c0_i32, %arg1 : i32, i32, i32
  }
  func.func @transform_8(%arg0: i32, %arg1: i32) -> (i32, i32, i32) {
    %c0_i32 = arith.constant 0 : i32
    %c0_i32_0 = arith.constant 0 : i32
    return %arg0, %c0_i32, %arg1 : i32, i32, i32
  }
  func.func @transform_9(%arg0: i32, %arg1: i32) -> (i32, i32, i32) {
    %c0_i32 = arith.constant 0 : i32
    %c0_i32_0 = arith.constant 0 : i32
    %c0_i32_1 = arith.constant 0 : i32
    return %arg0, %c0_i32, %c0_i32_0 : i32, i32, i32
  }
}

</mosaic_0001>

<bundles_post_ra>
// kernel: tpu_custom_call.1
= control target key start
LH: loop header
LB: loop body
LE: loop exit
PB: predicated region body
PF: predicated region fallthrough
CT: control target
= control target key end

     0   :  { %s2626_s0 = inlined_call_operand.hbm [shape: bf16[2,16,128], index: 0, kind: input, shape index: {}]   ;;  %s2627_s1 = inlined_call_operand.hbm [shape: bf16[2,16,128], index: 1, kind: input, shape index: {}]   ;;  %s2628_s2 = inlined_call_operand.hbm [shape: bf16[2,128,128], index: 2, kind: input, shape index: {}]   ;;  %s2629_s3 = inlined_call_operand.vmem [shape: f32[2,1,128], index: 3, kind: input, shape index: {}]   ;;  %s2630_s4 = inlined_call_operand.hbm [shape: bf16[2,128,128], index: 4, kind: input, shape index: {}]   ;;  %s2631_s5 = inlined_call_operand.vmem [shape: f32[2,1,128], index: 5, kind: input, shape index: {}]   ;;  %s2632_s6 = inlined_call_operand.hbm [shape: bf16[2,128,128], index: 6, kind: input, shape index: {}]   ;;  %s2633_s7 = inlined_call_operand.vmem [shape: f32[2,1,128], index: 7, kind: input, shape index: {}]   ;;  %s2634_s8 = inlined_call_operand.hbm [shape: f32[2,16,128], index: 8, kind: output, shape index: {0}]   ;;  %s2635_s9 = inlined_call_operand.hbm [shape: f32[2,16,128], index: 9, kind: output, shape index: {1}]  }
   0x1   :  { %2655 = sst [smem:[#allocation27_spill]] %s2627_s1 }
   0x2   :  { %2656 = sst [smem:[#allocation28_spill]] %s2630_s4 }
   0x3   :  { %2657 = sst [smem:[#allocation29_spill]] %s2633_s7 }
   0x4   :  { %2658 = sst [smem:[#allocation30_spill]] %s2634_s8 }
   0x5   :  { %2659 = sst [smem:[#allocation31_spill]] %s2635_s9 }
   0x6   :  { %15 = vsyncpa [#allocation4], 0 }
   0x7   :  { %17 = vsyncpa [#allocation4 + $0x1], 0 }
   0x8   :  { %18 = vsyncpa [#allocation7], 0 }
   0x9   :  { %20 = vsyncpa [#allocation7 + $0x1], 0 }
   0xa   :  { %21 = vsyncpa [#allocation10], 0 }
   0xb   :  { %23 = vsyncpa [#allocation10 + $0x1], 0 }
   0xc   :  { %24 = vsyncpa [#allocation5], 0 }
   0xd   :  { %26 = vsyncpa [#allocation5 + $0x1], 0 }
   0xe   :  { %27 = vsyncpa [#allocation14], 0 }
   0xf   :  { %29 = vsyncpa [#allocation14 + $0x1], 0  ;;  %s2096_s30 = smov 0   ;;  %s2098_s10 = smov 0  }
  0x10   :  { %s2100_s11 = smov 0   ;;  %s2102_s12 = smov 0  }
  0x11   :  { %s2104_s13 = smov 0   ;;  %s2106_s14 = smov 0  }
  0x12 LB: > { %2660 = sst [smem:[#allocation20_spill]] %s2011_s30  ;;  %s2127_s15 = sadd.s32 4294967295, %s2031_s14   ;;  %s2031_s14 = sphi %s2106_s14, %s35_s14   ;;  %s2027_s13 = sphi %s2104_s13, %s2701_s13   ;;  %s2023_s12 = sphi %s2102_s12, %s2700_s12   ;;  %s2019_s11 = sphi %s2100_s11, %s2696_s11   ;;  %s2015_s10 = sphi %s2098_s10, %s2699_s10   ;;  %s2011_s30 = sphi %s2096_s30, %s2698_s30  }
  0x13   : > { %2661 = sst [smem:[#allocation21_spill]] %s2019_s11  ;;  %s1431_s16 = sadd.s32 4294967294, %s2031_s14  }
  0x14   : > { %2662 = sst [smem:[#allocation22_spill]] %s2031_s14  ;;  %s47_s17 = sadd.s32 1, %s2027_s13 }
  0x15   : > { %s54_s18 = sadd.s32 1, %s2019_s11  ;;  %p49_p0 = scmp.ge.s32.totalorder %s47_s17, 2 }
  0x16   : > { %p61_p1 = scmp.ne.s32.totalorder %s2019_s11, %s2015_s10  ;;  %p62_p2 = scmp.eq.s32.totalorder %s2031_s14, 0 }
  0x17   : > { %p67_p3 = scmp.ne.s32.totalorder %s2015_s10, %s2011_s30  ;;  %s2703_s17 = smov (%p49_p0, %s47_s17), 0 }
  0x18   : > { %2663 = sst [smem:[#allocation23_spill]] %s2703_s17  ;;  %p2139_p4 = por %p62_p2, %p61_p1 }
  0x19   : > { %p68_p5 = scmp.eq.s32.totalorder %s2127_s15, 0  ;;  %s51_s20 = ssub.s32 %s2027_s13, %s2703_s17 }
  0x1a   : > { %p279_p6 = scmp.eq.s32.totalorder %s2127_s15, 1  ;;  %p52_p7 = scmp.eq.s32.totalorder %s51_s20, 0 }
  0x1b   : > { %p2147_p8 = por %p68_p5, %p67_p3  ;;  %p285_p10 = scmp.eq.s32.totalorder %s1431_s16, 1 }
  0x1c   : > { %p2151_p9 = por %p279_p6, %p61_p1  ;;  %p1662_p13 = scmp.lt.s32.totalorder %s2031_s14, 2 }
  0x1d   : > { %s2665_s21 = scalar_select %p2147_p8, 1, 0 }
  0x1e   : > { %s2666_s22 = scalar_select %p2151_p9, 1, 0 }
  0x1f   : > { %s2156_s23 = scalar_select %p52_p7, %s2019_s11, %s54_s18  }
  0x20   : > { %2667 = sst [smem:[#allocation24_spill]] %s2666_s22  ;;  %p2158_p11 = por %p285_p10, %p67_p3 }
  0x21   : > { %2668 = sst [smem:[#allocation25_spill]] %s2156_s23  ;;  %s2165_s25 = sand.u32 1, %s2019_s11  }
  0x22   : > { %s2669_s24 = scalar_select %p2158_p11, 1, 0 }
  0x23   : > { %s2638_s26 = sshll.u32 %s2165_s25, 3  ;;  %s2639_s27 = sshll.u32 %s2027_s13, 7 }
  0x24   : > { %2670 = sst [smem:[#allocation26_spill]] %s2669_s24  ;;  %p2171_p0 = pnand %p1662_p13, %p2139_p4 }
  0x25   : > { %s2641_s29 = sand.u32 1, %s2031_s14   ;;  %s2672_s1 = sld [smem:[#allocation27_spill]] }
  0x26   : > { %s356_s17 = scalar_lea.vmem [#allocation6], %s2638_s26  ;;  %s2191_s19 = scalar_lea.sflag [#allocation7], %s2641_s29 }
  0x27   : > { %s363_s23 = sshll.u32 %s356_s17, 4  ;;  %p2197_p4 = pneg %p2171_p0  ;;  %s2186_s23 = int_to_ptr.vmem [resolvable:$true] %s363_s23 }
  0x2b   : > { %s2181_s20 = scalar_lea.hbm %s2672_s1, %s2639_s27  ;;  %s1764_s26 = scalar_lea.hbm %s2672_s1, 256 }
  0x2c   : > { %s1759_s11 = scalar_lea.hbm %s2181_s20, 128  ;;  %p1765_p7 = scmp.lt.u32.totalorder %s2181_s20, %s2672_s1 }
  0x2d   : > { %p1760_p3 = scmp.ne.s32.totalorder %s2181_s20, %s1759_s11  ;;  %p1766_p10 = scmp.lt.u32.totalorder %s1764_s26, %s1759_s11 }
  0x2e   : > { %p1768_p12 = scmp.lt.u32.totalorder %s1759_s11, %s2181_s20 }
  0x2f   : > { %p1762_p5 = pnand %p2197_p4, %p1760_p3  ;;  %p1767_p13 = por %p1766_p10, %p1765_p7 }
  0x31   : > { %p1763_p6 = pneg %p1762_p5  ;;  %p1769_p1 = por %p1768_p12, %p1767_p13 }
  0x33   : > { %p1770_p2 = pnand %p1769_p1, %p1763_p6 }
  0x35   : > { %1773 = shalt.err (!%p1770_p2)
}
  0x36   : > { %s1774_s29 = scalar_lea.vmem %s2186_s23, 128  ;;  %s2033_s18 = smov [#allocation6]  }
  0x37   : > { %p1775_p3 = scmp.ne.s32.totalorder %s2186_s23, %s1774_s29  ;;  %s1779_s17 = sshll.u32 %s2033_s18, 4  ;;  %s1780_s17 = int_to_ptr.vmem [resolvable:$false] %s1779_s17 }
  0x38   : > { %s1781_s24 = scalar_lea.vmem %s1780_s17, 256  ;;  %p1782_p9 = scmp.lt.s32.totalorder %s2186_s23, %s1780_s17 }
  0x39   : > { %p1777_p5 = pnand %p1775_p3, %p2197_p4  ;;  %p1783_p8 = scmp.lt.s32.totalorder %s1781_s24, %s1774_s29 }
  0x3b   : > { %p1778_p11 = pneg %p1777_p5  ;;  %p1784_p7 = por %p1783_p8, %p1782_p9 }
  0x3d   : > { %p1785_p10 = pnand %p1784_p7, %p1778_p11 }
  0x3f   : > { %1788 = shalt.err (!%p1785_p10)
}
  0x40   : > { %s2644_s11 = smov 64   ;;  %s2646_s26 = smov 4  }
  0x41   : > { %1645 = dma.hbm_to_vmem [thread:$0]  (!%p2171_p0), %s2181_s20, 128, %s2186_s23, %s2191_s19, %s2644_s11, %s2644_s11, %s2646_s26  }
  0x42   : > { %p2674_p8 = scmp.lt.s32.totalorder %s2031_s14, 3  ;;  %p2675_p9 = scmp.ge.s32.totalorder %s2031_s14, 1 }
  0x43   : > { %s2233_s29 = sshll.u32 %s2165_s25, 6  ;;  %s2236_s18 = sshll.u32 %s2027_s13, 10 }
  0x44   : > { %p2228_p11 = pnand %p2675_p9, %p2674_p8  ;;  %s2677_s4 = sld [smem:[#allocation28_spill]] }
  0x45   : > { %s404_s23 = scalar_lea.vmem [#allocation9], %s2233_s29  ;;  %s2678_s11 = sand.u32 1, %s2031_s14  }
  0x46   : > { %s2676_s27 = scalar_select %p2228_p11, 1, 0 }
  0x47   : > { %s411_s20 = sshll.u32 %s404_s23, 4  ;;  %s2249_s26 = scalar_lea.sflag [#allocation10], %s2678_s11  ;;  %s2245_s20 = int_to_ptr.vmem [resolvable:$true] %s411_s20 }
  0x4a   : > { %s2242_s1 = scalar_lea.hbm %s2677_s4, %s2236_s18  ;;  %s1794_s24 = scalar_lea.hbm %s2677_s4, 2048 }
  0x4b   : > { %s1789_s30 = scalar_lea.hbm %s2242_s1, 1024  ;;  %p1795_p6 = scmp.lt.u32.totalorder %s2242_s1, %s2677_s4 }
  0x4c   : > { %p1790_p12 = scmp.ne.s32.totalorder %s2242_s1, %s1789_s30  ;;  %p1796_p13 = scmp.lt.u32.totalorder %s1794_s24, %s1789_s30 }
  0x4d   : > { %p1798_p5 = scmp.lt.u32.totalorder %s1789_s30, %s2242_s1 }
  0x4e   : > { %p1792_p1 = pnand %p1790_p12, %p2197_p4  ;;  %p1797_p3 = por %p1796_p13, %p1795_p6 }
  0x50   : > { %p1793_p2 = pneg %p1792_p1  ;;  %p1799_p7 = por %p1798_p5, %p1797_p3 }
  0x52   : > { %p1800_p10 = pnand %p1799_p7, %p1793_p2 }
  0x54   : > { %1803 = shalt.err (!%p1800_p10)
}
  0x55   : > { %s1804_s11 = scalar_lea.vmem %s2245_s20, 1024  ;;  %s2036_s8 = smov [#allocation9]  }
  0x56   : > { %p1805_p8 = scmp.ne.s32.totalorder %s2245_s20, %s1804_s11  ;;  %s1809_s23 = sshll.u32 %s2036_s8, 4  ;;  %s1810_s23 = int_to_ptr.vmem [resolvable:$false] %s1809_s23 }
  0x57   : > { %s1811_s7 = scalar_lea.vmem %s1810_s23, 2048  ;;  %p1812_p1 = scmp.lt.s32.totalorder %s2245_s20, %s1810_s23 }
  0x58   : > { %p1807_p9 = pnand %p1805_p8, %p2197_p4  ;;  %p1813_p11 = scmp.lt.s32.totalorder %s1811_s7, %s1804_s11 }
  0x5a   : > { %p1808_p12 = pneg %p1807_p9  ;;  %p1814_p6 = por %p1813_p11, %p1812_p1 }
  0x5c   : > { %p1815_p13 = pnand %p1814_p6, %p1808_p12 }
  0x5e   : > { %1818 = shalt.err (!%p1815_p13)
}
  0x5f   : > { %s2679_s9 = smov 4   ;;  %s2680_s30 = smov 64  }
  0x60   : > { %1651 = dma.hbm_to_vmem [thread:$0]  (!%p2171_p0), %s2242_s1, 1024, %s2245_s20, %s2249_s26, %s2680_s30, %s2680_s30, %s2679_s9  }
  0x61   : > { %s2681_s17 = sshll.u32 %s2027_s13, 7  ;;  %s2682_s23 = sshll.u32 %s2165_s25, 3 }
  0x62   : > { %s2281_s11 = scalar_lea.hbm %s2626_s0, %s2681_s17  ;;  %s335_s7 = scalar_lea.vmem [#allocation3], %s2682_s23 }
  0x63   : > { %s342_s4 = sshll.u32 %s335_s7, 4  ;;  %s332_s14 = scalar_lea.sflag [#allocation4], %s2165_s25  ;;  %s2285_s4 = int_to_ptr.vmem [resolvable:$true] %s342_s4 }
  0x64   : > { %s1819_s22 = scalar_lea.hbm %s2281_s11, 128  ;;  %s1824_s17 = scalar_lea.hbm %s2626_s0, 256 }
  0x65   : > { %p1820_p11 = scmp.ne.s32.totalorder %s2281_s11, %s1819_s22  ;;  %p1825_p5 = scmp.lt.u32.totalorder %s2281_s11, %s2626_s0 }
  0x66   : > { %p1826_p7 = scmp.lt.u32.totalorder %s1824_s17, %s1819_s22  ;;  %p1828_p8 = scmp.lt.u32.totalorder %s1819_s22, %s2281_s11 }
  0x67   : > { %p1822_p2 = pnand %p1820_p11, %p2197_p4 }
  0x68   : > { %p1827_p10 = por %p1826_p7, %p1825_p5 }
  0x69   : > { %p1823_p3 = pneg %p1822_p2 }
  0x6a   : > { %p1829_p9 = por %p1828_p8, %p1827_p10 }
  0x6c   : > { %p1830_p12 = pnand %p1829_p9, %p1823_p3 }
  0x6e   : > { %1833 = shalt.err (!%p1830_p12)
}
  0x6f   : > { %s1834_s23 = scalar_lea.vmem %s2285_s4, 128  ;;  %s2037_s7 = smov [#allocation3]  }
  0x70   : > { %p1835_p1 = scmp.ne.s32.totalorder %s2285_s4, %s1834_s23  ;;  %s1839_s1 = sshll.u32 %s2037_s7, 4  ;;  %s1840_s1 = int_to_ptr.vmem [resolvable:$false] %s1839_s1 }
  0x71   : > { %s1841_s20 = scalar_lea.vmem %s1840_s1, 256  ;;  %p1842_p11 = scmp.lt.s32.totalorder %s2285_s4, %s1840_s1 }
  0x72   : > { %p1837_p6 = pnand %p1835_p1, %p2197_p4  ;;  %p1843_p2 = scmp.lt.s32.totalorder %s1841_s20, %s1834_s23 }
  0x74   : > { %p1838_p13 = pneg %p1837_p6  ;;  %p1844_p5 = por %p1843_p2, %p1842_p11 }
  0x76   : > { %p1845_p7 = pnand %p1844_p5, %p1838_p13 }
  0x78   : > { %1848 = shalt.err (!%p1845_p7)
}
  0x79   : > { %1642 = dma.hbm_to_vmem [thread:$0]  (!%p2171_p0), %s2281_s11, 128, %s2285_s4, %s332_s14, %s2680_s30, %s2680_s30, %s2679_s9  }
  0x7a   : > { %s2318_s24 = scalar_lea.hbm %s2628_s2, %s2236_s18  ;;  %s377_s8 = scalar_lea.vmem [#allocation8], %s2233_s29 }
  0x7b   : > { %s384_s23 = sshll.u32 %s377_s8, 4  ;;  %s1849_s25 = scalar_lea.hbm %s2318_s24, 1024  ;;  %s2321_s23 = int_to_ptr.vmem [resolvable:$true] %s384_s23 }
  0x7c   : > { %p1850_p3 = scmp.ne.s32.totalorder %s2318_s24, %s1849_s25  ;;  %s1854_s14 = scalar_lea.hbm %s2628_s2, 2048 }
  0x7d   : > { %p1855_p9 = scmp.lt.u32.totalorder %s2318_s24, %s2628_s2  ;;  %p1856_p12 = scmp.lt.u32.totalorder %s1854_s14, %s1849_s25 }
  0x7e   : > { %p1852_p10 = pnand %p1850_p3, %p2197_p4  ;;  %p1858_p6 = scmp.lt.u32.totalorder %s1849_s25, %s2318_s24 }
  0x7f   : > { %p1857_p1 = por %p1856_p12, %p1855_p9 }
  0x80   : > { %p1853_p8 = pneg %p1852_p10 }
  0x81   : > { %p1859_p13 = por %p1858_p6, %p1857_p1 }
  0x83   : > { %p1860_p11 = pnand %p1859_p13, %p1853_p8 }
  0x85   : > { %1863 = shalt.err (!%p1860_p11)
}
  0x86   : > { %s1864_s20 = scalar_lea.vmem %s2321_s23, 1024  ;;  %s2038_s22 = smov [#allocation8]  }
  0x87   : > { %p1865_p2 = scmp.ne.s32.totalorder %s2321_s23, %s1864_s20  ;;  %s1869_s17 = sshll.u32 %s2038_s22, 4  ;;  %s1870_s17 = int_to_ptr.vmem [resolvable:$false] %s1869_s17 }
  0x88   : > { %s1871_s8 = scalar_lea.vmem %s1870_s17, 2048  ;;  %p1872_p3 = scmp.lt.s32.totalorder %s2321_s23, %s1870_s17 }
  0x89   : > { %p1867_p5 = pnand %p1865_p2, %p2197_p4  ;;  %p1873_p10 = scmp.lt.s32.totalorder %s1871_s8, %s1864_s20 }
  0x8b   : > { %p1868_p7 = pneg %p1867_p5  ;;  %p1874_p9 = por %p1873_p10, %p1872_p3 }
  0x8d   : > { %p1875_p12 = pnand %p1874_p9, %p1868_p7 }
  0x8f   : > { %1878 = shalt.err (!%p1875_p12)
}
  0x90   : > { %1648 = dma.hbm_to_vmem [thread:$0]  (!%p2171_p0), %s2318_s24, 1024, %s2321_s23, %s2191_s19, %s2680_s30, %s2680_s30, %s2679_s9  }
  0x91   : > { %s2352_s4 = scalar_lea.hbm %s2632_s6, %s2236_s18  ;;  %s431_s14 = scalar_lea.vmem [#allocation11], %s2233_s29 }
  0x92   : > { %s439_s11 = sshll.u32 %s431_s14, 4  ;;  %s1879_s1 = scalar_lea.hbm %s2352_s4, 1024  ;;  %s2355_s11 = int_to_ptr.vmem [resolvable:$true] %s439_s11 }
  0x93   : > { %p1880_p8 = scmp.ne.s32.totalorder %s2352_s4, %s1879_s1  ;;  %s1884_s24 = scalar_lea.hbm %s2632_s6, 2048 }
  0x94   : > { %p1885_p13 = scmp.lt.u32.totalorder %s2352_s4, %s2632_s6  ;;  %p1886_p11 = scmp.lt.u32.totalorder %s1884_s24, %s1879_s1 }
  0x95   : > { %p1882_p1 = pnand %p1880_p8, %p2197_p4  ;;  %p1888_p5 = scmp.lt.u32.totalorder %s1879_s1, %s2352_s4 }
  0x96   : > { %p1887_p2 = por %p1886_p11, %p1885_p13 }
  0x97   : > { %p1883_p6 = pneg %p1882_p1 }
  0x98   : > { %p1889_p7 = por %p1888_p5, %p1887_p2 }
  0x9a   : > { %p1890_p3 = pnand %p1889_p7, %p1883_p6 }
  0x9c   : > { %1893 = shalt.err (!%p1890_p3)
}
  0x9d   : > { %s1894_s29 = scalar_lea.vmem %s2355_s11, 1024  ;;  %s2039_s22 = smov [#allocation11]  }
  0x9e   : > { %p1895_p10 = scmp.ne.s32.totalorder %s2355_s11, %s1894_s29  ;;  %s1899_s17 = sshll.u32 %s2039_s22, 4  ;;  %s1900_s17 = int_to_ptr.vmem [resolvable:$false] %s1899_s17 }
  0x9f   : > { %s1901_s8 = scalar_lea.vmem %s1900_s17, 2048  ;;  %p1902_p8 = scmp.lt.s32.totalorder %s2355_s11, %s1900_s17 }
  0xa0   : > { %p1897_p9 = pnand %p1895_p10, %p2197_p4  ;;  %p1903_p1 = scmp.lt.s32.totalorder %s1901_s8, %s1894_s29 }
  0xa2   : > { %p1898_p12 = pneg %p1897_p9  ;;  %p1904_p13 = por %p1903_p1, %p1902_p8 }
  0xa4   : > { %p1905_p11 = pnand %p1904_p13, %p1898_p12 }
  0xa6   : > { %1908 = shalt.err (!%p1905_p11)
}
  0xa7   : > { %1654 = dma.hbm_to_vmem [thread:$0]  (!%p2171_p0), %s2352_s4, 1024, %s2355_s11, %s2249_s26, %s2680_s30, %s2680_s30, %s2679_s9  }
  0xa8   : > { %p2683_p4 = scmp.ne.s32.totalorder %s2676_s27, 0 }
  0xa9   : > { %s2385_s16 = sand.u32 (!%p2683_p4), 1, %s2015_s10   ;;  %p2684_p6 = scmp.ne.s32.totalorder (!%p2683_p4), %s2665_s21, 0 }
  0xaa   : > { %460 = sbr.rel (%p2683_p4) target bundleno = 1665 (0x681), region = 52  ;;  %s1450_s25 = sshll.u32 (!%p2683_p4), %s2385_s16, 3 }
  0xab   : > { %s463_s7 = scalar_lea.sflag (!%p2683_p4), [#allocation4], %s2385_s16  ;;  %s2389_s14 = scalar_lea.vmem (!%p2683_p4), [#allocation3], %s1450_s25 }
  0xb1   : > { %1990 = dma.done.wait (%p2684_p6), %s463_s7, 128  }
  0xb2   : > { %1992 = vsyncadd (%p2684_p6), %s463_s7, 4294967168  ;;  %s471_s28 = sand.u32 1, %s2127_s15   ;;  %s2396_s27 = scalar_lea.vmem [#allocation6], %s1450_s25 }
  0xb3   : > { %s472_s26 = scalar_lea.sflag [#allocation7], %s471_s28 }
  0xb4   : > { %1994 = dma.done.wait (%p2684_p6), %s472_s26, 1152  }
  0xb5   : > { %1996 = vsyncadd (%p2684_p6), %s472_s26, 4294966144  ;;  %s2403_s9 = sshll.u32 %s2385_s16, 6  ;;  %s490_s4 = scalar_lea.sflag [#allocation10], %s471_s28 }
  0xb6   : > { %s2406_s30 = scalar_lea.vmem [#allocation8], %s2403_s9  ;;  %s2409_s11 = scalar_lea.vmem [#allocation9], %s2403_s9 }
  0xb7   : > { %1998 = dma.done.wait (%p2684_p6), %s490_s4, 2048  }
  0xb8   : > { %2000 = vsyncadd (%p2684_p6), %s490_s4, 4294965248  ;;  %v2040_v0 = vmov 0.0   ;;  %vm2041_vm0 = vmmov 0   ;;  %v1718_v1 = vld [vmem:[%s2406_s30] sm:$0xff]   ;;  %v1719_v2 = vld [vmem:[%s2406_s30 + $0x8] sm:$0xff]   ;;  %p574_p0 = scmp.lt.s32.totalorder %s2023_s12, 1 }
  0xb9   : > { %1541 = vmatprep.subr.bf16.mxu0 %v2040_v0  ;;  %1557 = vmatprep.mubr.msk.bf16.mxu0 %vm2041_vm0, %v2040_v0  ;;  %v1720_v3 = vld [vmem:[%s2406_s30 + $0x10] sm:$0xff]   ;;  %v1721_v4 = vld [vmem:[%s2406_s30 + $0x18] sm:$0xff]   ;;  %v1722_v5 = vld [vmem:[%s2406_s30 + $0x20] sm:$0xff]   ;;  %s1455_s19 = sshll.u32 %s2385_s16, 4  ;;  %vm852_vm1 = vcmask 1043456   ;;  %vm824_vm2 = vcmask 64512  }
  0xba   : > { %1561 = vmatprep.subr.bf16.mxu1 %v2040_v0  ;;  %1563 = vmatprep.mubr.msk.bf16.mxu1 %vm2041_vm0, %v2040_v0  ;;  %v1723_v6 = vld [vmem:[%s2406_s30 + $0x28] sm:$0xff]   ;;  %v1724_v7 = vld [vmem:[%s2406_s30 + $0x30] sm:$0xff]   ;;  %v1725_v8 = vld [vmem:[%s2406_s30 + $0x38] sm:$0xff]   ;;  %s2442_s15 = scalar_select %p574_p0, %s2023_s12, 1 }
  0xbb   : > { %1542 = vmatpush3.bf16.msra.mxu0 %v1718_v1  ;;  %v1726_v9 = vld [vmem:[%s2389_s14] sm:$0xff]   ;;  %s2451_s24 = scalar_lea.vmem [#allocation13], %s1455_s19  ;;  %v2459_v22 = vld [vmem:[%s2396_s27] sm:$0xf]  ;;  %v2466_v23 = vld [vmem:[%s2396_s27 + $0x4] sm:$0xf] }
  0xbc   : > { %1543 = vmatprep.subr.bf16.mxu0 %v2040_v0  ;;  %s576_s20 = scalar_lea.vmem %s2629_s3, %s2442_s15  ;;  %v1727_v47 = vld [vmem:[%s2409_s11] sm:$0xff]   ;;  %v1728_v48 = vld [vmem:[%s2409_s11 + $0x8] sm:$0xff]   ;;  %v1729_v49 = vld [vmem:[%s2409_s11 + $0x10] sm:$0xff]   ;;  %s2500_s23 = scalar_lea.vmem [#allocation11], %s2403_s9 }
  0xbd   : > { %v1457_v10 = vld [vmem:[%s576_s20] ss:$0 sm:$0xff]  ;;  %v1730_v50 = vld [vmem:[%s2409_s11 + $0x18] sm:$0xff]   ;;  %v1732_v60 = vld [vmem:[%s2409_s11 + $0x28] sm:$0xff]   ;;  %s579_s22 = scalar_lea.vmem %s2631_s5, %s2442_s15  ;;  %s2685_s17 = sld [smem:[#allocation24_spill]] }
  0xbe   : > { %v1731_v51 = vld [vmem:[%s2409_s11 + $0x20] sm:$0xff]   ;;  %v1733_v61 = vld [vmem:[%s2409_s11 + $0x30] sm:$0xff]   ;;  %v1734_v62 = vld [vmem:[%s2409_s11 + $0x38] sm:$0xff]   ;;  %s1197_s8 = sshll.u32 %s2451_s24, 4  ;;  %s1504_s25 = sshll.u32 %s2023_s12, 8  ;;  %s2525_s8 = int_to_ptr.vmem [resolvable:$true] %s1197_s8 }
  0xbf   : > { %1544 = vmatpush3.bf16.msra.mxu0 %v1719_v2  ;;  %v1735_v63 = vld [vmem:[%s2500_s23] sm:$0xff]   ;;  %v1736_v1 = vld [vmem:[%s2500_s23 + $0x8] sm:$0xff]   ;;  %v1737_v2 = vld [vmem:[%s2500_s23 + $0x10] sm:$0xff]   ;;  %s2686_s28 = sld [smem:[#allocation31_spill]]  ;;  %s1167_s27 = scalar_lea.sflag [#allocation14], %s2385_s16 }
  0xc0   : > { %1545 = vmatprep.subr.bf16.mxu0 %v2040_v0  ;;  %s1909_s9 = scalar_lea.vmem %s2525_s8, 256  ;;  %s2042_s30 = smov [#allocation13]  }
  0xc1   : > { %p1910_p2 = scmp.ne.s32.totalorder %s2525_s8, %s1909_s9  ;;  %s1913_s4 = sshll.u32 %s2042_s30, 4  ;;  %s1914_s4 = int_to_ptr.vmem [resolvable:$false] %s1913_s4 }
  0xc2   : > { %s1915_s11 = scalar_lea.vmem %s1914_s4, 512  ;;  %p1916_p10 = scmp.lt.s32.totalorder %s2525_s8, %s1914_s4 }
  0xc3   : > { %1546 = vmatpush3.bf16.msra.mxu0 %v1720_v3  ;;  %v1738_v3 = vld [vmem:[%s2500_s23 + $0x18] sm:$0xff]   ;;  %p2687_p5 = scmp.ne.s32.totalorder %s2685_s17, 0  ;;  %p1917_p9 = scmp.lt.s32.totalorder %s1915_s11, %s1909_s9 }
  0xc4   : > { %1547 = vmatprep.subr.bf16.mxu0 %v2040_v0 }
  0xc5   : > { %s2532_s26 = scalar_lea.hbm %s2686_s28, %s1504_s25  ;;  %p1911_p7 = pnand %p1910_p2, %p2687_p5 }
  0xc6   : > { %p1918_p12 = por %p1917_p9, %p1916_p10 }
  0xc7   : > { %1548 = vmatpush3.bf16.msra.mxu0 %v1721_v4  ;;  %p1912_p3 = pneg %p1911_p7 }
  0xc8   : > { %1549 = vmatprep.subr.bf16.mxu0 %v2040_v0 }
  0xc9   : > { %p1919_p8 = pnand %p1918_p12, %p1912_p3 }
  0xcb   : > { %1550 = vmatpush3.bf16.msra.mxu0 %v1722_v5 }
  0xcc   : > { %1551 = vmatprep.subr.bf16.mxu0 %v2040_v0 }
  0xcf   : > { %1552 = vmatpush3.bf16.msra.mxu0 %v1723_v6 }
  0xd0   : > { %1553 = vmatprep.subr.bf16.mxu0 %v2040_v0 }
  0xd3   : > { %1554 = vmatpush3.bf16.msra.mxu0 %v1724_v7 }
  0xd4   : > { %1555 = vmatprep.subr.bf16.mxu0 %v2040_v0 }
  0xd7   : > { %1556 = vmatpush3.bf16.msra.mxu0 %v1725_v8  ;;  %v942_v8 = vunpack.c.l.bf16 %v2459_v22 }
  0xd8   : > { %1585 = vmatprep.subr.bf16.mxu0 %v2040_v0 }
  0xda   : > { %1558 = vmatmul.mubr.bf16.vlgmr.msra.gmra.mrb[0].mxu0 %v1726_v9  ;;  %v943_v9 = vunpack.c.l.bf16 %v2466_v23 }
  0xdb   : > { %1601 = vmatprep.mubr.msk.bf16.mxu0 %vm2041_vm0, %v2040_v0  ;;  %1586 = vmatpush3.bf16.msra.mxu0 %v1727_v47 }
  0xdc   : > { %1587 = vmatprep.subr.bf16.mxu0 %v2040_v0 }
  0xdf   : > { %1588 = vmatpush3.bf16.msra.mxu0 %v1728_v48 }
  0xe0   : > { %1589 = vmatprep.subr.bf16.mxu0 %v2040_v0 }
  0xe3   : > { %1590 = vmatpush3.bf16.msra.mxu0 %v1729_v49 }
  0xe4   : > { %1591 = vmatprep.subr.bf16.mxu0 %v2040_v0 }
  0xe7   : > { %1592 = vmatpush3.bf16.msra.mxu0 %v1730_v50 }
  0xe8   : > { %1593 = vmatprep.subr.bf16.mxu0 %v2040_v0 }
  0xeb   : > { %1594 = vmatpush3.bf16.msra.mxu0 %v1731_v51 }
  0xec   : > { %1595 = vmatprep.subr.bf16.mxu0 %v2040_v0 }
  0xef   : > { %1596 = vmatpush3.bf16.msra.mxu0 %v1732_v60 }
  0xf0   : > { %1597 = vmatprep.subr.bf16.mxu0 %v2040_v0 }
  0xf3   : > { %1598 = vmatpush3.bf16.msra.mxu0 %v1733_v61 }
  0xf4   : > { %1599 = vmatprep.subr.bf16.mxu0 %v2040_v0 }
  0xf7   : > { %1600 = vmatpush3.bf16.msra.mxu0 %v1734_v62 }
 0x1ad   : > { %v704_v11 = vpop.f32.mrb[0].mxu0 }
 0x1ae   : > { %v705_v12 = vadd.f32 %v1457_v10, %v704_v11  ;;  %v1559_v13 = vpop.f32.mrb[1].mxu0 }
 0x1af   : > { %v707_v14 = vpop.f32.mrb[2].mxu0 }
 0x1b0   : > { %1743 = vtanh.f32 %v705_v12  ;;  %v708_v15 = vadd.f32 %v1457_v10, %v707_v14  ;;  %v1560_v16 = vpop.f32.mrb[3].mxu0 }
 0x1b2   : > { %1745 = vtanh.f32 %v708_v15 }
 0x1ba   : > { %v1744_v17 = vpop.eup %1743 }
 0x1bb   : > { %v1502_v18 = vpack.c.bf16 %v1744_v17, %v1744_v17  ;;  %713 = vst [vmem:[%s2451_s24] sm:$0xff] %v1744_v17  ;;  %v1739_v17 = vld [vmem:[%s2500_s23 + $0x20] sm:$0xff]  }
 0x1bc   : > { %v1746_v19 = vpop.eup %1745 }
 0x1bd   : > { %1562 = vmatpush3.bf16.xpose.msra.mxu1 %v1502_v18  ;;  %v1503_v20 = vpack.c.bf16 %v1746_v19, %v1746_v19  ;;  %714 = vst [vmem:[%s2451_s24 + $0x8] sm:$0xff] %v1746_v19  ;;  %v854_v24 = vsel %vm852_vm1, %v1502_v18, 0  ;;  %v1740_v18 = vld [vmem:[%s2500_s23 + $0x28] sm:$0xff]   ;;  %v1741_v19 = vld [vmem:[%s2500_s23 + $0x30] sm:$0xff]  }
 0x1be   : > { %1567 = vmatprep.subr.bf16.mxu1 %v2040_v0 }
 0x1bf   : > { %v2456_v21 = vsel %vm852_vm1, %v1503_v20, 0 }
 0x1c4   : > { %1564 = vmatmul.mubr.bf16.vlgmr.msra.gmra.mrb[0].mxu1 %v2459_v22 }
 0x1c5   : > { %1568 = vmatpush3.bf16.xpose.msra.mxu1 %v1503_v20  ;;  %1569 = vmatprep.mubr.msk.bf16.mxu1 %vm2041_vm0, %v2040_v0  ;;  %v1742_v20 = vld [vmem:[%s2500_s23 + $0x38] sm:$0xff]  }
 0x1c6   : > { %1573 = vmatprep.subr.bf16.mxu1 %v2040_v0 }
 0x1cc   : > { %1570 = vmatmul.mubr.bf16.vlgmr.msra.gmra.mrb[4].mxu1 %v2466_v23 }
 0x1cd   : > { %1574 = vmatpush3.bf16.msra.mxu1 %v854_v24  ;;  %1575 = vmatprep.mubr.msk.bf16.mxu1 %vm2041_vm0, %v2040_v0 }
 0x1ce   : > { %1579 = vmatprep.subr.bf16.mxu1 %v2040_v0 }
 0x297   : > { %v776_v25 = vpop.f32.mrb[0].mxu1 }
 0x298   : > { %v822_v26 = vmul.f32 0.17677669, %v776_v25  ;;  %v1565_v27 = vpop.f32.mrb[1].mxu1 }
 0x299   : > { %v779_v28 = vpop.f32.mrb[2].mxu1 }
 0x29a   : > { %v1566_v29 = vpop.f32.mrb[3].mxu1  ;;  %v825_v30 = vsel %vm824_vm2, %v822_v26, -inf }
 0x29b   : > { %826 = vmax.xlane.f32.xlu0 %v825_v30 }
 0x29f   : > { %v816_v31 = vpop.f32.mrb[4].mxu1 }
 0x2a0   : > { %v823_v32 = vmul.f32 0.17677669, %v816_v31  ;;  %v1571_v33 = vpop.f32.mrb[5].mxu1 }
 0x2a1   : > { %v819_v34 = vpop.f32.mrb[6].mxu1 }
 0x2a2   : > { %v1572_v35 = vpop.f32.mrb[7].mxu1  ;;  %v828_v36 = vsel %vm824_vm2, %v823_v32, -inf }
 0x2a3   : > { %829 = vmax.xlane.f32.xlu0 %v828_v36 }
 0x328   : > { %v827_v37 = vpop.xlane.xlu0 %826 }
 0x329   : > { %v831_v38 = vsub.f32 %v822_v26, %v827_v37 }
 0x32b   : > { %v833_v39 = vmul.f32 1.442695, %v831_v38 }
 0x32d   : > { %1747 = vpow2.f32 %v833_v39 }
 0x330   : > { %v830_v40 = vpop.xlane.xlu0 %829 }
 0x331   : > { %v832_v41 = vsub.f32 %v823_v32, %v830_v40 }
 0x333   : > { %v835_v42 = vmul.f32 1.442695, %v832_v41 }
 0x335   : > { %1749 = vpow2.f32 %v835_v42 }
 0x337   : > { %v1748_v43 = vpop.eup %1747 }
 0x338   : > { %v837_v44 = vsel %vm824_vm2, %v1748_v43, 0.0 }
 0x339   : > { %838 = vadd.xlane.f32.xlu1 %v837_v44 }
 0x33f   : > { %v1750_v45 = vpop.eup %1749 }
 0x340   : > { %v840_v46 = vsel %vm824_vm2, %v1750_v45, 0.0 }
 0x341   : > { %841 = vadd.xlane.f32.xlu1 %v840_v46 }
 0x3c6   : > { %v839_v52 = vpop.xlane.xlu1 %838 }
 0x3c7   : > { %1751 = vrcp.f32 %v839_v52 }
 0x3ce   : > { %v842_v53 = vpop.xlane.xlu1 %841 }
 0x3cf   : > { %1753 = vrcp.f32 %v842_v53 }
 0x3d1   : > { %v1752_v54 = vpop.eup %1751 }
 0x3d2   : > { %v844_v55 = vmul.f32 %v1752_v54, %v1748_v43 }
 0x3d4   : > { %v847_v56 = vpack.c.bf16 %v844_v55, %v844_v55 }
 0x3d6   : > { %1576 = vmatmul.mubr.msk.bf16.vlgmr.msra.gmra.mrb[8].mxu1 %vm824_vm2, %v847_v56 }
 0x3d7   : > { %1580 = vmatpush3.bf16.msra.mxu1 %v2456_v21  ;;  %1581 = vmatprep.mubr.msk.bf16.mxu1 %vm2041_vm0, %v2040_v0  ;;  %v1471_v21 = vld [vmem:[%s579_s22] ss:$0 sm:$0xff] }
 0x3d8   : > { %1605 = vmatprep.subr.bf16.mxu1 %v2040_v0 }
 0x3d9   : > { %v1754_v57 = vpop.eup %1753 }
 0x3da   : > { %v846_v58 = vmul.f32 %v1754_v57, %v1750_v45 }
 0x3dc   : > { %v848_v59 = vpack.c.bf16 %v846_v58, %v846_v58 }
 0x3de   : > { %1582 = vmatmul.mubr.msk.bf16.vlgmr.msra.gmra.mrb[12].mxu1 %vm824_vm2, %v848_v59 }
 0x3df   : > { %1621 = vmatprep.mubr.msk.bf16.mxu1 %vm2041_vm0, %v2040_v0  ;;  %1606 = vmatpush3.bf16.msra.mxu1 %v1735_v63 }
 0x3e0   : > { %1607 = vmatprep.subr.bf16.mxu1 %v2040_v0 }
 0x3e3   : > { %1608 = vmatpush3.bf16.msra.mxu1 %v1736_v1 }
 0x3e4   : > { %1609 = vmatprep.subr.bf16.mxu1 %v2040_v0 }
 0x3e7   : > { %1610 = vmatpush3.bf16.msra.mxu1 %v1737_v2 }
 0x3e8   : > { %1611 = vmatprep.subr.bf16.mxu1 %v2040_v0 }
 0x3eb   : > { %1612 = vmatpush3.bf16.msra.mxu1 %v1738_v3 }
 0x3ec   : > { %1613 = vmatprep.subr.bf16.mxu1 %v2040_v0 }
 0x3ef   : > { %1614 = vmatpush3.bf16.msra.mxu1 %v1739_v17 }
 0x3f0   : > { %1615 = vmatprep.subr.bf16.mxu1 %v2040_v0 }
 0x3f3   : > { %1616 = vmatpush3.bf16.msra.mxu1 %v1740_v18 }
 0x3f4   : > { %1617 = vmatprep.subr.bf16.mxu1 %v2040_v0 }
 0x3f7   : > { %1618 = vmatpush3.bf16.msra.mxu1 %v1741_v19 }
 0x3f8   : > { %1619 = vmatprep.subr.bf16.mxu1 %v2040_v0 }
 0x3fb   : > { %1620 = vmatpush3.bf16.msra.mxu1 %v1742_v20 }
 0x4a9   : > { %v890_v4 = vpop.f32.mrb[8].mxu1 }
 0x4aa   : > { %v1577_v5 = vpop.f32.mrb[9].mxu1  ;;  %v944_v11 = vadd.f32 %v942_v8, %v890_v4 }
 0x4ab   : > { %v893_v6 = vpop.f32.mrb[10].mxu1 }
 0x4ac   : > { %v1578_v7 = vpop.f32.mrb[11].mxu1 }
 0x4b1   : > { %v936_v10 = vpop.f32.mrb[12].mxu1 }
 0x4b2   : > { %v945_v12 = vadd.f32 %v943_v9, %v936_v10  ;;  %v1583_v13 = vpop.f32.mrb[13].mxu1 }
 0x4b3   : > { %v939_v14 = vpop.f32.mrb[14].mxu1 }
 0x4b4   : > { %v946_v15 = vpack.c.bf16 %v945_v12, %v944_v11  ;;  %v1584_v16 = vpop.f32.mrb[15].mxu1 }
 0x4b6   : > { %1602 = vmatmul.mubr.bf16.vlgmr.msra.gmra.mrb[4].mxu0 %v946_v15 }
 0x589   : > { %v1035_v22 = vpop.f32.mrb[4].mxu0 }
 0x58a   : > { %v1036_v23 = vadd.f32 %v1471_v21, %v1035_v22  ;;  %v1603_v24 = vpop.f32.mrb[5].mxu0 }
 0x58b   : > { %v1038_v25 = vpop.f32.mrb[6].mxu0 }
 0x58c   : > { %v1039_v26 = vadd.f32 %v1471_v21, %v1038_v25  ;;  %v1604_v27 = vpop.f32.mrb[7].mxu0  ;;  %1755 = vtanh.f32 %v1036_v23 }
 0x58e   : > { %1757 = vtanh.f32 %v1039_v26 }
 0x596   : > { %v1756_v0 = vpop.eup %1755 }
 0x598   : > { %v1758_v28 = vpop.eup %1757 }
 0x599   : > { %v1044_v29 = vpack.c.bf16 %v1758_v28, %v1756_v0 }
 0x59b   : > { %1622 = vmatmul.mubr.bf16.vlgmr.msra.gmra.mrb[16].mxu1 %v1044_v29 }
 0x59c   : > { %1922 = shalt.err (!%p1919_p8)
}
 0x59d   : > { %s1923_s21 = scalar_lea.hbm %s2532_s26, 256  ;;  %s1927_s24 = scalar_lea.hbm %s2686_s28, 512 }
 0x59e   : > { %p1924_p1 = scmp.ne.s32.totalorder %s2532_s26, %s1923_s21  ;;  %p1928_p4 = scmp.lt.u32.totalorder %s2532_s26, %s2686_s28 }
 0x59f   : > { %p1929_p6 = scmp.lt.u32.totalorder %s1927_s24, %s1923_s21  ;;  %p1931_p2 = scmp.lt.u32.totalorder %s1923_s21, %s2532_s26 }
 0x5a0   : > { %p1925_p13 = pnand %p1924_p1, %p2687_p5 }
 0x5a1   : > { %p1930_p0 = por %p1929_p6, %p1928_p4 }
 0x5a2   : > { %p1926_p11 = pneg %p1925_p13 }
 0x5a3   : > { %p1932_p7 = por %p1931_p2, %p1930_p0 }
 0x5a5   : > { %p1933_p3 = pnand %p1932_p7, %p1926_p11 }
 0x5a7   : > { %1936 = shalt.err (!%p1933_p3)
}
 0x5a8   : > { %s2043_s29 = smov 128   ;;  %s2044_s22 = smov 8  }
 0x5a9   : > { %1636 = dma.vmem_to_hbm [thread:$0]  (%p2687_p5), %s2525_s8, 256, %s2532_s26, %s1167_s27, %s2043_s29, %s2043_s29, %s2044_s22  }
 0x5aa   : > { %s2688_s9 = sld [smem:[#allocation29_spill]]  ;;  %s566_s4 = scalar_lea.vmem [#allocation12], %s1455_s19 }
 0x5ab   : > { %s1181_s11 = sshll.u32 %s566_s4, 4  ;;  %s2689_s26 = sld [smem:[#allocation30_spill]]  ;;  %s2567_s11 = int_to_ptr.vmem [resolvable:$true] %s1181_s11 }
 0x5ac   : > { %s1162_s19 = scalar_lea.sflag [#allocation5], %s2385_s16  ;;  %s1937_s21 = scalar_lea.vmem %s2567_s11, 256 }
 0x5ad   : > { %p1938_p10 = scmp.ne.s32.totalorder %s2567_s11, %s1937_s21  ;;  %s2045_s1 = smov [#allocation12]  }
 0x5ae   : > { %s1941_s20 = sshll.u32 %s2045_s1, 4  ;;  %s1942_s20 = int_to_ptr.vmem [resolvable:$false] %s1941_s20 }
 0x5af   : > { %p1939_p9 = pnand %p1938_p10, %p2687_p5  ;;  %s1943_s24 = scalar_lea.vmem %s1942_s20, 512 }
 0x5b0   : > { %s585_s30 = scalar_lea.vmem %s2688_s9, %s2442_s15  ;;  %p1944_p8 = scmp.lt.s32.totalorder %s2567_s11, %s1942_s20 }
 0x5b1   : > { %v1480_v30 = vld [vmem:[%s585_s30] ss:$0 sm:$0xff]  ;;  %s2574_s27 = scalar_lea.hbm %s2689_s26, %s1504_s25  ;;  %p1940_p12 = pneg %p1939_p9 }
 0x5b2   : > { %p1945_p1 = scmp.lt.s32.totalorder %s1943_s24, %s1937_s21 }
 0x5b4   : > { %p1946_p13 = por %p1945_p1, %p1944_p8 }
 0x5b6   : > { %p1947_p11 = pnand %p1946_p13, %p1940_p12 }
 0x66e   : > { %v1152_v31 = vpop.f32.mrb[16].mxu1 }
 0x66f   : > { %v1153_v32 = vadd.f32 %v1480_v30, %v1152_v31  ;;  %v1623_v33 = vpop.f32.mrb[17].mxu1 }
 0x670   : > { %v1155_v34 = vpop.f32.mrb[18].mxu1 }
 0x671   : > { %1159 = vst [vmem:[%s566_s4] sm:$0xff] %v1153_v32  ;;  %v1156_v35 = vadd.f32 %v1480_v30, %v1155_v34  ;;  %v1624_v36 = vpop.f32.mrb[19].mxu1 }
 0x673   : > { %1160 = vst [vmem:[%s566_s4 + $0x8] sm:$0xff] %v1156_v35 }
 0x674   : > { %1950 = shalt.err (!%p1947_p11)
}
 0x675   : > { %s1951_s12 = scalar_lea.hbm %s2574_s27, 256  ;;  %s1955_s18 = scalar_lea.hbm %s2689_s26, 512 }
 0x676   : > { %p1952_p4 = scmp.ne.s32.totalorder %s2574_s27, %s1951_s12  ;;  %p1956_p2 = scmp.lt.u32.totalorder %s2574_s27, %s2689_s26 }
 0x677   : > { %p1957_p7 = scmp.lt.u32.totalorder %s1955_s18, %s1951_s12  ;;  %p1959_p10 = scmp.lt.u32.totalorder %s1951_s12, %s2574_s27 }
 0x678   : > { %p1953_p6 = pnand %p1952_p4, %p2687_p5 }
 0x679   : > { %p1958_p3 = por %p1957_p7, %p1956_p2 }
 0x67a   : > { %p1954_p0 = pneg %p1953_p6 }
 0x67b   : > { %p1960_p9 = por %p1959_p10, %p1958_p3 }
 0x67d   : > { %p1961_p12 = pnand %p1960_p9, %p1954_p0 }
 0x67f   : > { %1964 = shalt.err (!%p1961_p12)
}
 0x680   : > { %1635 = dma.vmem_to_hbm [thread:$0]  (%p2687_p5), %s2567_s11, 256, %s2574_s27, %s1162_s19, %s2043_s29, %s2043_s29, %s2044_s22  }
 0x681 PF: > { %s2690_s9 = sld [smem:[#allocation20_spill]]  ;;  %s2691_s30 = sld [smem:[#allocation26_spill]] }
 0x682   : > { %s2692_s4 = sld [smem:[#allocation22_spill]] }
 0x687   : > { %s1212_s8 = sand.u32 1, %s2690_s9   ;;  %p2693_p8 = scmp.ne.s32.totalorder %s2691_s30, 0 }
 0x688   : > { %p2694_p1 = scmp.ge.s32.totalorder %s2692_s4, 2  ;;  %s1213_s15 = scalar_lea.sflag [#allocation5], %s1212_s8 }
 0x68a   : > { %p1656_p13 = pnand %p2694_p1, %p2693_p8 }
 0x68c   : > { %2002 = dma.done.wait (!%p1656_p13), %s1213_s15, 256  }
 0x68d   : > { %2004 = vsyncadd (!%p1656_p13), %s1213_s15, 4294967040  ;;  %s1222_s17 = scalar_lea.sflag [#allocation14], %s1212_s8 }
 0x68e   : > { %2006 = dma.done.wait (!%p1656_p13), %s1222_s17, 256  }
 0x68f   : > { %2008 = vsyncadd (!%p1656_p13), %s1222_s17, 4294967040  ;;  %s35_s14 = sadd.s32 1, %s2692_s4   ;;  %s2695_s16 = sld [smem:[#allocation21_spill]] }
 0x690   : > { %p32_p11 = scmp.ge.s32.totalorder %s35_s14, 4   ;;  %s2696_s11 = sld [smem:[#allocation25_spill]] }
 0x691   : > { %s2697_s29 = sld [smem:[#allocation23_spill]]  ;;  %s2698_s30 = smov %s2015_s10 }
 0x692   : > { %s2700_s12 = smov %s2027_s13  ;;  %34 = sbr.rel (!%p32_p11) target bundleno = 18 (0x12), region = 175 }
 0x695   : > { %s2699_s10 = smov %s2695_s16 }
 0x697   : > { %s2701_s13 = smov %s2697_s29 }
 0x699   :  { %1227 = vsyncpa [#allocation4], 1 }
 0x69a   :  { %1229 = vsyncpa [#allocation4 + $0x1], 1 }
 0x69b   :  { %1230 = vsyncpa [#allocation7], 1 }
 0x69c   :  { %1232 = vsyncpa [#allocation7 + $0x1], 1 }
 0x69d   :  { %1233 = vsyncpa [#allocation10], 1 }
 0x69e   :  { %1235 = vsyncpa [#allocation10 + $0x1], 1 }
 0x69f   :  { %1236 = vsyncpa [#allocation5], 1 }
 0x6a0   :  { %1238 = vsyncpa [#allocation5 + $0x1], 1 }
 0x6a1   :  { %1239 = vsyncpa [#allocation14], 1 }
 0x6a2   :  { %1241 = vsyncpa [#allocation14 + $0x1], 1 }

</bundles_post_ra>
